<compile_context>
chip_gen: v6e
topology: v6e:2x2x1
jax: 0.10.0
libtpu: 0.0.40
codegen_flags: <defaults>
</compile_context>

<pallas_src>
import functools

import jax
import jax.numpy as jnp
from jax.experimental import pallas as pl
from jax.experimental.pallas import tpu as pltpu


# ----------------------------- kernels -------------------------------------


def _rotary_kernel_headslab(x_ref, c_ref, s_ref, o_ref):
    """x/o: (tt, H, D); c/s: (tt, D) f32 doubled tables (use when D % 128 == 0)."""
    x = x_ref[...]
    # Per-head half swap [x2, x1] == lane rotation by D//2 (XLU, leaves VPU free).
    x_rot = pltpu.roll(x, shift=x.shape[-1] // 2, axis=x.ndim - 1)
    c = jnp.broadcast_to(c_ref[...][:, None, :], x.shape)   # broadcast over heads
    s = jnp.broadcast_to(s_ref[...][:, None, :], x.shape)
    o_ref[...] = (x.astype(jnp.float32) * c
                  + x_rot.astype(jnp.float32) * s).astype(o_ref.dtype)


def _rotary_kernel_folded(x_ref, c_ref, s_ref, o_ref, *, head_dim):
    """x/o/c/s: (tt, H*D); heads folded into the lane axis (lane-dense stores)."""
    x = x_ref[...]
    w = x.shape[-1]
    half = head_dim // 2
    # Per-head half swap on the folded lane axis: lanes in the first half of a
    # head need x[lane + half]; lanes in the second half need x[lane - half].
    fwd = pltpu.roll(x, shift=w - half, axis=x.ndim - 1)   # out[i] = in[i + half]
    bwd = pltpu.roll(x, shift=half, axis=x.ndim - 1)       # out[i] = in[i - half]
    lane = jax.lax.broadcasted_iota(jnp.int32, x.shape, x.ndim - 1)
    x_rot = jnp.where((lane % head_dim) < half, fwd, bwd)
    o_ref[...] = (x.astype(jnp.float32) * c_ref[...]
                  + x_rot.astype(jnp.float32) * s_ref[...]).astype(o_ref.dtype)


# --------------------------- table construction ----------------------------


def init_rotary(dim, max_seq_len):
    """Build rotary tables once (outside the hot path)."""
    assert dim % 4 == 0, "head dim must be divisible by 4"
    quarter = dim // 4
    angular_freq = (1.0 / 1024.0) ** jnp.linspace(0.0, 1.0, quarter,
                                                  dtype=jnp.float32)
    angular_freq = jnp.concatenate(
        [angular_freq, jnp.zeros((quarter,), jnp.float32)])      # (dim//2,)
    t = jnp.arange(max_seq_len, dtype=jnp.float32)
    theta = t[:, None] * angular_freq[None, :]                   # (L, dim//2)
    cos, sin = jnp.cos(theta), jnp.sin(theta)
    # Doubled, lane-dense tables for the kernel: y = x*C + swap(x)*S.
    c_full = jnp.concatenate([cos, cos], axis=-1)                # (L, dim)
    s_full = jnp.concatenate([sin, -sin], axis=-1)               # (L, dim)
    return cos, sin, c_full, s_full


def fold_tables(c_full, s_full, num_heads):
    """Pre-tile the doubled tables across heads: (L, D) -> (L, H*D). Done once."""
    return jnp.tile(c_full, (1, num_heads)), jnp.tile(s_full, (1, num_heads))


# ------------------------------- wrapper ------------------------------------


def _vmem_capacity_bytes():
    try:
        cap = getattr(pltpu.get_tpu_info(), "vmem_capacity_bytes", None)
        if cap:
            return int(cap)
    except Exception:
        pass
    return 64 * 2**20      # conservative default (v7x per-TensorCore VMEM)


def rotary_forward(x, c_tab, s_tab, *, tt=1024):
    """Apply rotary embedding.

    x            : (B, T, H, D)
    c_tab/s_tab  : doubled cos/sin tables from init_rotary, either
        (L, D)    -> head-slab path (prefer when D % 128 == 0), or
        (L, H*D)  -> folded path (build once with fold_tables(...) when
                     D % 128 != 0, keeps output stores lane-dense)
    """
    B, T, H, D = x.shape
    assert D % 2 == 0
    L, W_tab = c_tab.shape
    assert s_tab.shape == (L, W_tab)
    assert L >= T, "sequence longer than rotary table"

    if W_tab == H * D and H > 1:
        folded = True
    elif W_tab == D:
        folded = False
    else:
        raise ValueError(f"table width {W_tab} matches neither D={D} nor H*D={H*D}")

    # ---- VMEM-driven tile sizing (per actual chip generation) ----
    itemsize = jnp.dtype(x.dtype).itemsize
    row_x = H * D * itemsize          # one sequence row of x (all heads)
    row_tab = W_tab * 4               # one f32 table row, per table (dense 2-D)
    row_f32 = H * D * 4               # in-kernel f32 temporaries
    # double-buffered in + out blocks, 2 double-buffered tables, ~3 f32 temps
    per_row = 2 * row_x + 2 * row_x + 2 * 2 * row_tab + 3 * row_f32

    vmem_cap = _vmem_capacity_bytes()
    tt_cap = max(8, int(0.6 * vmem_cap) // per_row // 8 * 8)

    tt = max(1, min(tt, tt_cap, T))
    if B == 1 and tt >= T and T >= 16:
        tt = max(8, (T // 2) // 8 * 8)       # keep >= 2 grid steps (v7x: 2 TCs)
    if tt < T and tt % 8 != 0:
        tt = max(8, (tt // 8) * 8)

    nblk = pl.cdiv(T, tt)
    grid = (nblk, B)                         # batch innermost: table block reused

    # Use the full-length tables directly (no per-call slice) whenever the
    # block shape is legal against them; fall back to a sliced view only for
    # tiny / oddly-shaped sequences.
    if tt % 8 == 0 and nblk * tt <= L:
        c_use, s_use = c_tab, s_tab
    else:
        c_use, s_use = c_tab[:T], s_tab[:T]

    vmem_needed = tt * per_row
    vmem_limit = int(min(max(int(1.3 * vmem_needed) + (4 << 20), 16 << 20),
                         int(0.9 * vmem_cap)))

    # "parallel" on both axes; per-core splitting on v7x could use CORE_PARALLEL.
    cparams = pltpu.CompilerParams(
        dimension_semantics=("parallel", "parallel"),
        vmem_limit_bytes=vmem_limit,
    )
    tab_spec = pl.BlockSpec((tt, W_tab), lambda t, b: (t, 0))

    if folded:
        W = H * D
        x2d = x.reshape(B, T, W)             # metadata-only view
        kern = functools.partial(_rotary_kernel_folded, head_dim=D)
        out = pl.pallas_call(
            kern,
            out_shape=jax.ShapeDtypeStruct((B, T, W), x.dtype),
            grid_spec=pltpu.PrefetchScalarGridSpec(
                num_scalar_prefetch=0,
                grid=grid,
                in_specs=[
                    pl.BlockSpec((None, tt, W), lambda t, b: (b, t, 0)),
                    tab_spec,
                    tab_spec,
                ],
                out_specs=pl.BlockSpec((None, tt, W), lambda t, b: (b, t, 0)),
            ),
            compiler_params=cparams,
        )(x2d, c_use, s_use)
        return out.reshape(B, T, H, D)

    out = pl.pallas_call(
        _rotary_kernel_headslab,
        out_shape=jax.ShapeDtypeStruct((B, T, H, D), x.dtype),
        grid_spec=pltpu.PrefetchScalarGridSpec(
            num_scalar_prefetch=0,
            grid=grid,
            in_specs=[
                pl.BlockSpec((None, tt, H, D), lambda t, b: (b, t, 0, 0)),
                tab_spec,
                tab_spec,
            ],
            out_specs=pl.BlockSpec((None, tt, H, D), lambda t, b: (b, t, 0, 0)),
        ),
        compiler_params=cparams,
    )(x, c_use, s_use)
    return out


# ------------------------------ reference -----------------------------------


def rotary_reference(x, cos, sin):
    """Pure-JAX port of the PyTorch forward."""
    T, D = x.shape[1], x.shape[-1]
    c = cos[None, :T, None, :]
    s = sin[None, :T, None, :]
    xf = x.astype(jnp.float32)
    x1, x2 = xf[..., : D // 2], xf[..., D // 2:]
    y1 = x1 * c + x2 * s
    y2 = -x1 * s + x2 * c
    return jnp.concatenate([y1, y2], axis=-1).astype(x.dtype)


if __name__ == "__main__":
    key = jax.random.PRNGKey(0)

    # ---- folded path (D not a multiple of 128): heads folded into lanes ----
    B, T, H, D = 2, 16, 4, 32            # folded lane width H*D = 128
    max_seq_len = 32
    cos, sin, c_full, s_full = init_rotary(D, max_seq_len)
    c_fold, s_fold = fold_tables(c_full, s_full, H)

    k0, k1, k2 = jax.random.split(key, 3)
    x = jax.random.normal(k0, (B, T, H, D), dtype=jnp.float32)
    y = jax.block_until_ready(rotary_forward(x, c_fold, s_fold))
    y_ref = rotary_reference(x, cos, sin)
    assert y.shape == x.shape and y.dtype == x.dtype
    assert jnp.allclose(y, y_ref, atol=1e-5, rtol=1e-5)

    # bfloat16 input (exercises the .float() / .type_as(x) cast path)
    xb = x.astype(jnp.bfloat16)
    yb = jax.block_until_ready(rotary_forward(xb, c_fold, s_fold))
    yb_ref = rotary_reference(xb, cos, sin)
    assert yb.dtype == jnp.bfloat16
    assert jnp.allclose(yb.astype(jnp.float32), yb_ref.astype(jnp.float32),
                        atol=1e-2, rtol=1e-2)

    # ragged sequence (tile does not divide T) against the full-length tables
    T2 = 12
    x2 = jax.random.normal(k1, (B, T2, H, D), dtype=jnp.float32)
    y2 = jax.block_until_ready(rotary_forward(x2, c_fold, s_fold, tt=8))
    assert jnp.allclose(y2, rotary_reference(x2, cos, sin), atol=1e-5, rtol=1e-5)

    # odd T (exercises the sliced-table fallback, tt == T not a multiple of 8)
    T3 = 10
    x3 = jax.random.normal(k2, (B, T3, H, D), dtype=jnp.float32)
    y3 = jax.block_until_ready(rotary_forward(x3, c_fold, s_fold))
    assert jnp.allclose(y3, rotary_reference(x3, cos, sin), atol=1e-5, rtol=1e-5)

    # ---- head-slab path (D multiple of 128): tables streamed as (L, D) ----
    B4, T4, H4, D4 = 2, 16, 2, 128
    cos4, sin4, c4, s4 = init_rotary(D4, 32)
    x4 = jax.random.normal(jax.random.PRNGKey(1), (B4, T4, H4, D4),
                           dtype=jnp.float32)
    y4 = jax.block_until_ready(rotary_forward(x4, c4, s4))
    assert jnp.allclose(y4, rotary_reference(x4, cos4, sin4),
                        atol=1e-5, rtol=1e-5)

    print("KERNEL_OK")
</pallas_src>

<mosaic_0001>
module attributes {stable_mosaic.version = 11 : i64} {
  func.func @_rotary_kernel_folded(%arg0: i32, %arg1: i32, %arg2: memref<1x16x128xf32, #tpu.memory_space<vmem>>, %arg3: memref<16x128xf32, #tpu.memory_space<vmem>>, %arg4: memref<16x128xf32, #tpu.memory_space<vmem>>, %arg5: memref<1x16x128xf32, #tpu.memory_space<vmem>>) attributes {dimension_semantics = [#tpu.dimension_semantics<parallel>, #tpu.dimension_semantics<parallel>], iteration_bounds = array<i64: 1, 2>, scalar_prefetch = 0 : i64, scratch_operands = 0 : i64, tpu.core_type = #tpu.core_type<tc>, window_params = [{transform_indices = @transform_0, window_bounds = array<i64: 1, 16, 128>}, {transform_indices = @transform_1, window_bounds = array<i64: 16, 128>}, {transform_indices = @transform_2, window_bounds = array<i64: 16, 128>}, {transform_indices = @transform_3, window_bounds = array<i64: 1, 16, 128>}]} {
    %c0 = arith.constant 0 : index
    %c0_0 = arith.constant 0 : index
    %c0_1 = arith.constant 0 : index
    %0 = vector.load %arg2[%c0, %c0_0, %c0_1] : memref<1x16x128xf32, #tpu.memory_space<vmem>>, vector<1x16x128xf32>
    %1 = vector.shape_cast %0 : vector<1x16x128xf32> to vector<16x128xf32>
    %c112_i32 = arith.constant 112 : i32
    %2 = tpu.dynamic_rotate %1 by %c112_i32 dim 1 : vector<16x128xf32>, i32 -> vector<16x128xf32>
    %c16_i32 = arith.constant 16 : i32
    %3 = tpu.dynamic_rotate %1 by %c16_i32 dim 1 : vector<16x128xf32>, i32 -> vector<16x128xf32>
    %4 = tpu.iota {dimensions = array<i32: 1>} : vector<16x128xi32>
    %c32_i32 = arith.constant 32 : i32
    %c0_i32 = arith.constant 0 : i32
    %5 = arith.cmpi eq, %c32_i32, %c0_i32 : i32
    %c1_i32 = arith.constant 1 : i32
    %6 = arith.select %5, %c1_i32, %c32_i32 : i32
    %7 = vector.broadcast %6 : i32 to vector<16x128xi32>
    %8 = arith.remsi %4, %7 : vector<16x128xi32>
    %c0_i32_2 = arith.constant 0 : i32
    %9 = vector.broadcast %c0_i32_2 : i32 to vector<16x128xi32>
    %10 = arith.cmpi ne, %8, %9 : vector<16x128xi32>
    %c0_i32_3 = arith.constant 0 : i32
    %11 = vector.broadcast %c0_i32_3 : i32 to vector<16x128xi32>
    %12 = arith.cmpi slt, %8, %11 : vector<16x128xi32>
    %c0_i32_4 = arith.constant 0 : i32
    %13 = arith.cmpi slt, %6, %c0_i32_4 : i32
    %14 = vector.broadcast %13 : i1 to vector<16x128xi1>
    %15 = vector.broadcast %14 : vector<16x128xi1> to vector<16x128xi1>
    %16 = arith.xori %12, %15 : vector<16x128xi1>
    %17 = arith.andi %16, %10 : vector<16x128xi1>
    %18 = vector.broadcast %6 : i32 to vector<16x128xi32>
    %19 = arith.addi %8, %18 : vector<16x128xi32>
    %20 = arith.select %17, %19, %8 : vector<16x128xi1>, vector<16x128xi32>
    %c16_i32_5 = arith.constant 16 : i32
    %21 = vector.broadcast %c16_i32_5 : i32 to vector<16x128xi32>
    %22 = arith.cmpi slt, %20, %21 : vector<16x128xi32>
    %23 = arith.select %22, %2, %3 : vector<16x128xi1>, vector<16x128xf32>
    %c0_6 = arith.constant 0 : index
    %c0_7 = arith.constant 0 : index
    %24 = vector.load %arg3[%c0_6, %c0_7] : memref<16x128xf32, #tpu.memory_space<vmem>>, vector<16x128xf32>
    %25 = arith.mulf %1, %24 : vector<16x128xf32>
    %c0_8 = arith.constant 0 : index
    %c0_9 = arith.constant 0 : index
    %26 = vector.load %arg4[%c0_8, %c0_9] : memref<16x128xf32, #tpu.memory_space<vmem>>, vector<16x128xf32>
    %27 = arith.mulf %23, %26 : vector<16x128xf32>
    %28 = arith.addf %25, %27 : vector<16x128xf32>
    %c0_10 = arith.constant 0 : index
    %c0_11 = arith.constant 0 : index
    %c0_12 = arith.constant 0 : index
    %29 = vector.load %arg5[%c0_10, %c0_11, %c0_12] : memref<1x16x128xf32, #tpu.memory_space<vmem>>, vector<1x16x128xf32>
    %30 = vector.shape_cast %29 : vector<1x16x128xf32> to vector<16x128xf32>
    %31 = vector.shape_cast %28 : vector<16x128xf32> to vector<1x16x128xf32>
    tpu.vector_store %arg5[%c0_10, %c0_11, %c0_12], %31 {strides = array<i32>} : memref<1x16x128xf32, #tpu.memory_space<vmem>>, vector<1x16x128xf32>,
    return
  }
  func.func @transform_0(%arg0: i32, %arg1: i32) -> (i32, i32, i32) {
    %c0_i32 = arith.constant 0 : i32
    %c0_i32_0 = arith.constant 0 : i32
    return %arg1, %arg0, %c0_i32 : i32, i32, i32
  }
  func.func @transform_1(%arg0: i32, %arg1: i32) -> (i32, i32) {
    %c0_i32 = arith.constant 0 : i32
    %c0_i32_0 = arith.constant 0 : i32
    return %arg0, %c0_i32 : i32, i32
  }
  func.func @transform_2(%arg0: i32, %arg1: i32) -> (i32, i32) {
    %c0_i32 = arith.constant 0 : i32
    %c0_i32_0 = arith.constant 0 : i32
    return %arg0, %c0_i32 : i32, i32
  }
  func.func @transform_3(%arg0: i32, %arg1: i32) -> (i32, i32, i32) {
    %c0_i32 = arith.constant 0 : i32
    %c0_i32_0 = arith.constant 0 : i32
    return %arg1, %arg0, %c0_i32 : i32, i32, i32
  }
}

</mosaic_0001>

<bundles_post_ra>
// kernel: tpu_custom_call.1
= control target key start
LH: loop header
LB: loop body
LE: loop exit
PB: predicated region body
PF: predicated region fallthrough
CT: control target
= control target key end

     0   :  { %8 = vsyncpa [#allocation3], 0  ;;  %s932_s0 = inlined_call_operand.hbm [shape: f32[2,16,128], index: 0, kind: input, shape index: {}]   ;;  %s933_s1 = inlined_call_operand.hbm [shape: f32[32,128], index: 1, kind: input, shape index: {}]   ;;  %s934_s2 = inlined_call_operand.hbm [shape: f32[32,128], index: 2, kind: input, shape index: {}]   ;;  %s935_s3 = inlined_call_operand.hbm [shape: f32[2,16,128], index: 3, kind: output, shape index: {}]  }
   0x1   :  { %10 = vsyncpa [#allocation3 + $0x1], 0 }
   0x2   :  { %11 = vsyncpa [#allocation6], 0 }
   0x3   :  { %12 = vsyncpa [#allocation4], 0 }
   0x4   :  { %14 = vsyncpa [#allocation4 + $0x1], 0  ;;  %s727_s12 = smov 0   ;;  %s729_s13 = smov 0  }
   0x5   :  { %s731_s14 = smov 0   ;;  %s733_s15 = smov 0  }
   0x6   :  { %s735_s16 = smov 0   ;;  %s737_s17 = smov 0  }
   0x7 LB: > { %s421_s18 = sadd.s32 4294967295, %s695_s17   ;;  %s422_s19 = sadd.s32 4294967294, %s695_s17   ;;  %s695_s17 = sphi %s737_s17, %s20_s17   ;;  %s691_s16 = sphi %s735_s16, %s954_s16   ;;  %s687_s15 = sphi %s733_s15, %s953_s15   ;;  %s683_s14 = sphi %s731_s14, %s952_s14   ;;  %s679_s13 = sphi %s729_s13, %s951_s13   ;;  %s675_s12 = sphi %s727_s12, %s950_s12  }
   0x8   : > { %p54_p0 = scmp.ne.s32.totalorder %s679_s13, %s675_s12  ;;  %p761_p1 = scmp.eq.s32.totalorder %s421_s18, 0 }
   0x9   : > { %p765_p2 = scmp.eq.s32.totalorder %s421_s18, 1  ;;  %p138_p3 = scmp.eq.s32.totalorder %s422_s19, 1 }
   0xa   : > { %p771_p4 = por %p761_p1, %p54_p0  ;;  %p423_p5 = scmp.ge.s32.totalorder %s695_s17, 1 }
   0xb   : > { %p776_p6 = por %p138_p3, %p54_p0  ;;  %p145_p7 = scmp.lt.s32.totalorder %s695_s17, 3 }
   0xc   : > { %s697_s25 = smov [#allocation5]   ;;  %s698_s28 = smov [#allocation7]  }
   0xd   : > { %s940_s23 = scalar_select %p776_p6, 1, 0 }
   0xe   : > { %p781_p8 = pnand %p423_p5, %p145_p7  ;;  %s160_s26 = sshll.u32 %s697_s25, 4  ;;  %s161_s26 = int_to_ptr.vmem [resolvable:$true] %s160_s26 }
   0xf   : > { %s176_s29 = sshll.u32 %s698_s28, 4  ;;  %s542_s30 = scalar_lea.vmem %s161_s26, 256  ;;  %s177_s29 = int_to_ptr.vmem [resolvable:$true] %s176_s29 }
  0x10   : > { %p454_p9 = pneg %p781_p8  ;;  %p543_p13 = scmp.ne.s32.totalorder %s161_s26, %s542_s30 }
  0x11   : > { %p550_p5 = scmp.lt.s32.totalorder %s161_s26, %s161_s26  ;;  %p551_p7 = scmp.lt.s32.totalorder %s542_s30, %s542_s30 }
  0x12   : > { %p790_p11 = pnand %p454_p9, %p761_p1 }
  0x13   : > { %p552_p10 = por %p551_p7, %p550_p5 }
  0x14   : > { %p533_p12 = pneg %p790_p11 }
  0x16   : > { %p545_p0 = pnand %p543_p13, %p533_p12 }
  0x18   : > { %p546_p3 = pneg %p545_p0 }
  0x1a   : > { %p553_p9 = pnand %p552_p10, %p546_p3 }
  0x1c   : > { %556 = shalt.err (!%p553_p9)
}
  0x1d   : > { %s936_s4 = smov 128   ;;  %s700_s5 = smov 8  }
  0x1e   : > { %457 = dma.hbm_to_vmem [thread:$0]  (!%p790_p11), %s933_s1, 256, %s161_s26, [#allocation6], %s936_s4, %s936_s4, %s700_s5  }
  0x1f   : > { %s568_s8 = scalar_lea.vmem %s177_s29, 256  ;;  %p576_p10 = scmp.lt.s32.totalorder %s177_s29, %s177_s29 }
  0x20   : > { %p569_p13 = scmp.ne.s32.totalorder %s177_s29, %s568_s8  ;;  %p577_p3 = scmp.lt.s32.totalorder %s568_s8, %s568_s8 }
  0x22   : > { %p571_p0 = pnand %p569_p13, %p533_p12  ;;  %p578_p7 = por %p577_p3, %p576_p10 }
  0x24   : > { %p572_p5 = pneg %p571_p0 }
  0x26   : > { %p579_p9 = pnand %p578_p7, %p572_p5 }
  0x28   : > { %582 = shalt.err (!%p579_p9)
}
  0x29   : > { %460 = dma.hbm_to_vmem [thread:$0]  (!%p790_p11), %s934_s2, 256, %s177_s29, [#allocation6], %s936_s4, %s936_s4, %s700_s5  }
  0x2a   : > { %s29_s11 = sadd.s32 1, %s691_s16  ;;  %s41_s18 = sadd.s32 1, %s683_s14 }
  0x2b   : > { %p30_p12 = scmp.ge.s32.totalorder %s29_s11, 2  ;;  %p48_p13 = scmp.ne.s32.totalorder %s683_s14, %s679_s13 }
  0x2c   : > { %p49_p0 = scmp.eq.s32.totalorder %s695_s17, 0  ;;  %p471_p5 = scmp.lt.s32.totalorder %s695_s17, 2 }
  0x2d   : > { %s956_s11 = smov (%p30_p12, %s29_s11), 0  ;;  %p828_p3 = por %p765_p2, %p48_p13 }
  0x2e   : > { %p50_p10 = por %p49_p0, %p48_p13  ;;  %s36_s25 = ssub.s32 %s691_s16, %s956_s11 }
  0x2f   : > { %s190_s26 = sand.u32 1, %s683_s14   ;;  %p39_p7 = scmp.eq.s32.totalorder %s36_s25, 0 }
  0x30   : > { %s427_s27 = sshll.u32 %s190_s26, 4  ;;  %s440_s28 = sshll.u32 %s691_s16, 8 }
  0x31   : > { %s837_s29 = scalar_select %p39_p7, %s683_s14, %s41_s18  }
  0x32   : > { %s202_s7 = scalar_lea.hbm %s932_s0, %s440_s28  ;;  %s194_s8 = scalar_lea.vmem [#allocation2], %s427_s27 }
  0x33   : > { %s203_s9 = sshll.u32 %s194_s8, 4  ;;  %p844_p11 = pnand %p471_p5, %p50_p10  ;;  %s204_s9 = int_to_ptr.vmem [resolvable:$true] %s203_s9 }
  0x34   : > { %s191_s10 = scalar_lea.sflag [#allocation3], %s190_s26  ;;  %s596_s25 = scalar_lea.vmem %s204_s9, 256 }
  0x35   : > { %p585_p2 = pneg %p844_p11  ;;  %p597_p9 = scmp.ne.s32.totalorder %s204_s9, %s596_s25 }
  0x36   : > { %s701_s18 = smov [#allocation2]  }
  0x37   : > { %p599_p12 = pnand %p597_p9, %p585_p2  ;;  %s601_s4 = sshll.u32 %s701_s18, 4  ;;  %s602_s4 = int_to_ptr.vmem [resolvable:$false] %s601_s4 }
  0x38   : > { %s603_s28 = scalar_lea.vmem %s602_s4, 512  ;;  %p604_p0 = scmp.lt.s32.totalorder %s204_s9, %s602_s4 }
  0x39   : > { %p600_p13 = pneg %p599_p12  ;;  %p605_p7 = scmp.lt.s32.totalorder %s603_s28, %s596_s25 }
  0x3b   : > { %p606_p6 = por %p605_p7, %p604_p0 }
  0x3d   : > { %p607_p5 = pnand %p606_p6, %p600_p13 }
  0x3f   : > { %610 = shalt.err (!%p607_p5)
}
  0x40   : > { %s945_s27 = smov 128   ;;  %215 = sbr.rel (%p781_p8) target bundleno = 211 (0xd3), region = 32 }
  0x41   : > { %464 = dma.hbm_to_vmem [thread:$0]  (!%p844_p11), %s202_s7, 256, %s204_s9, %s191_s10, %s945_s27, %s945_s27, %s700_s5  }
  0x42   : > { %s858_s26 = sand.u32 (!%p781_p8), 1, %s679_s13  }
  0x43   : > { %s431_s4 = sshll.u32 (!%p781_p8), %s858_s26, 4  ;;  %s218_s30 = scalar_lea.sflag (!%p781_p8), [#allocation3], %s858_s26 }
  0x44   : > { %s221_s6 = scalar_lea.vmem (!%p781_p8), [#allocation2], %s431_s4 }
  0x45   : > { %662 = dma.done.wait (%p771_p4), %s218_s30, 256  }
  0x46   : > { %664 = vsyncadd (%p771_p4), %s218_s30, 4294967040 }
  0x47   : > { %666 = dma.done.wait (%p761_p1), [#allocation6], 512  }
  0x48   : > { %668 = vsyncadd (%p761_p1), [#allocation6], 4294966784  ;;  %v256_v0 = vld [vmem:[%s221_s6] sm:$0xff]  ;;  %s702_s24 = smov 16   ;;  %s703_s5 = smov 112   ;;  %v257_v1 = vld [vmem:[%s221_s6 + $0x8] sm:$0xff]  ;;  %v266_v2 = vlaneseq }
  0x49   : > { %262 = vrot.lane.b32.xlu1 %v256_v0, %s702_s24  ;;  %258 = vrot.lane.b32.xlu0 %v256_v0, %s703_s5  ;;  %v283_v5 = vld [vmem:[#allocation5] sm:$0xff]  ;;  %v287_v7 = vld [vmem:[#allocation7] sm:$0xff]  ;;  %v284_v11 = vld [vmem:[#allocation5 + $0x8] sm:$0xff]  ;;  %s251_s20 = scalar_lea.vmem [#allocation8], %s431_s4  ;;  %s441_s7 = sshll.u32 %s687_s15, 8 }
  0x4a   : > { %v267_v3 = vand.u32 127, %v266_v2  ;;  %v285_v8 = vmul.f32 %v283_v5, %v256_v0  ;;  %s311_s22 = sshll.u32 %s251_s20, 4  ;;  %v288_v14 = vld [vmem:[#allocation7 + $0x8] sm:$0xff]  ;;  %v286_v15 = vmul.f32 %v284_v11, %v257_v1  ;;  %s884_s21 = scalar_lea.hbm %s935_s3, %s441_s7  ;;  %s879_s22 = int_to_ptr.vmem [resolvable:$true] %s311_s22 }
  0x4b   : > { %s296_s10 = scalar_lea.sflag [#allocation4], %s858_s26  ;;  %s611_s25 = scalar_lea.vmem %s879_s22, 256 }
  0x4c   : > { %v272_v4 = vand.u32 31, %v267_v3  ;;  %p612_p1 = scmp.ne.s32.totalorder %s879_s22, %s611_s25  ;;  %s704_s15 = smov [#allocation8]  }
  0x4d   : > { %264 = vrot.lane.b32.xlu1 %v257_v1, %s702_s24  ;;  %260 = vrot.lane.b32.xlu0 %v257_v1, %s703_s5  ;;  %s615_s18 = sshll.u32 %s704_s15, 4  ;;  %s616_s18 = int_to_ptr.vmem [resolvable:$false] %s615_s18 }
  0x4e   : > { %vm870_vm0 = vcmp.lt.s32.totalorder %v272_v4, 16  ;;  %p613_p4 = pnand %p612_p1, %p828_p3  ;;  %s617_s28 = scalar_lea.vmem %s616_s18, 512 }
  0x4f   : > { %p618_p8 = scmp.lt.s32.totalorder %s879_s22, %s616_s18  ;;  %p619_p10 = scmp.lt.s32.totalorder %s617_s28, %s611_s25 }
  0x50   : > { %p614_p6 = pneg %p613_p4 }
  0x51   : > { %p620_p11 = por %p619_p10, %p618_p8 }
  0x53   : > { %p621_p2 = pnand %p620_p11, %p614_p6 }
  0xbb   : > { %v263_v9 = vpop.permute.xlu1 %262  ;;  %v259_v10 = vpop.permute.xlu0 %258 }
  0xbc   : > { %v281_v12 = vsel %vm870_vm0, %v259_v10, %v263_v9 }
  0xbd   : > { %v289_v13 = vmul.f32 %v287_v7, %v281_v12 }
  0xbf   : > { %v291_v16 = vadd.f32 %v289_v13, %v285_v8  ;;  %v265_v17 = vpop.permute.xlu1 %264  ;;  %v261_v18 = vpop.permute.xlu0 %260 }
  0xc0   : > { %v282_v19 = vsel %vm870_vm0, %v261_v18, %v265_v17 }
  0xc1   : > { %293 = vst [vmem:[%s251_s20] sm:$0xff] %v291_v16  ;;  %v290_v20 = vmul.f32 %v288_v14, %v282_v19 }
  0xc3   : > { %v292_v21 = vadd.f32 %v290_v20, %v286_v15 }
  0xc5   : > { %294 = vst [vmem:[%s251_s20 + $0x8] sm:$0xff] %v292_v21 }
  0xc6   : > { %624 = shalt.err (!%p621_p2)
}
  0xc7   : > { %s625_s27 = scalar_lea.hbm %s884_s21, 256  ;;  %s629_s6 = scalar_lea.hbm %s935_s3, 512 }
  0xc8   : > { %p626_p9 = scmp.ne.s32.totalorder %s884_s21, %s625_s27  ;;  %p630_p0 = scmp.lt.s32.totalorder %s884_s21, %s935_s3 }
  0xc9   : > { %p631_p7 = scmp.lt.s32.totalorder %s629_s6, %s625_s27 }
  0xca   : > { %p627_p12 = pnand %p626_p9, %p828_p3 }
  0xcb   : > { %p632_p5 = por %p631_p7, %p630_p0 }
  0xcc   : > { %p628_p13 = pneg %p627_p12 }
  0xce   : > { %p633_p1 = pnand %p632_p5, %p628_p13 }
  0xd0   : > { %636 = shalt.err (!%p633_p1)
}
  0xd1   : > { %s705_s20 = smov 128   ;;  %s706_s7 = smov 8  }
  0xd2   : > { %452 = dma.vmem_to_hbm [thread:$0]  (%p828_p3), %s879_s22, 256, %s884_s21, %s296_s10, %s705_s20, %s705_s20, %s706_s7  }
  0xd3 PF: > { %s326_s8 = sand.u32 1, %s675_s12   ;;  %p948_p4 = scmp.ne.s32.totalorder %s940_s23, 0 }
  0xd4   : > { %p949_p6 = scmp.ge.s32.totalorder %s695_s17, 2  ;;  %s327_s9 = scalar_lea.sflag [#allocation4], %s326_s8 }
  0xd6   : > { %p466_p8 = pnand %p949_p6, %p948_p4 }
  0xd8   : > { %p467_p10 = pneg %p466_p8 }
  0xda   : > { %670 = dma.done.wait (%p467_p10), %s327_s9, 256  }
  0xdb   : > { %672 = vsyncadd (%p467_p10), %s327_s9, 4294967040  ;;  %s20_s17 = sadd.s32 1, %s695_s17   ;;  %s950_s12 = smov %s679_s13 }
  0xdc   : > { %p17_p11 = scmp.ge.s32.totalorder %s20_s17, 4   ;;  %s951_s13 = smov %s683_s14 }
  0xdd   : > { %s952_s14 = smov %s837_s29  ;;  %s953_s15 = smov %s691_s16 }
  0xde   : > { %s954_s16 = smov %s956_s11  ;;  %19 = sbr.rel (!%p17_p11) target bundleno = 7 (0x7), region = 87 }
  0xe3   :  { %332 = vsyncpa [#allocation3], 1 }
  0xe4   :  { %334 = vsyncpa [#allocation3 + $0x1], 1 }
  0xe5   :  { %335 = vsyncpa [#allocation6], 1 }
  0xe6   :  { %336 = vsyncpa [#allocation4], 1 }
  0xe7   :  { %338 = vsyncpa [#allocation4 + $0x1], 1 }

</bundles_post_ra>
